<compile_context>
chip_gen: v7x
topology: tpu7x:2x2x1
jax: 0.10.0
libtpu: 0.0.40
codegen_flags: <defaults>
</compile_context>

<pallas_src>
import math

import jax
import jax.numpy as jnp
import numpy as np
from jax.experimental import pallas as pl
from jax.experimental.pallas import tpu as pltpu


def cnn_kernel(src_ref, pos_ref, mask_ref, emb_ref, wtap_ref, bconv_ref,
               wout_ref, bout_ref, o_ref):
    # src_ref : (BL, 1) int32   flattened token ids (BL = batch_block * L)
    # pos_ref : (BL, 1) int32   position within each sequence (0..L-1)
    # mask_ref: (BL, 1) f32     1.0 = valid token, 0.0 = pad
    # emb_ref : (V, E)  f32     embedding table
    # wtap_ref: (3E, H) f32     conv taps stacked along K: [W(k=0); W(k=1); W(k=2)]
    # bconv_ref: (1, H); wout_ref: (H, C); bout_ref: (1, C)
    # o_ref   : (Bblk, C)
    BL = src_ref.shape[0]
    V, E = emb_ref.shape
    Bblk = o_ref.shape[0]
    L = BL // Bblk

    # --- Embedding gather fused as a one-hot matmul (MXU) --------------------
    ids = src_ref[...]                                            # (BL, 1)
    lanes = jax.lax.broadcasted_iota(jnp.int32, (BL, V), 1)
    onehot = (lanes == ids).astype(jnp.float32)                   # (BL, V)
    x = jnp.dot(onehot, emb_ref[...],
                preferred_element_type=jnp.float32)               # (BL, E)

    # --- Conv1d(k=3, pad=1) as ONE (BL, 3E) @ (3E, H) matmul ------------------
    # out[b, t] = x[b, t-1] @ W0 + x[b, t] @ W1 + x[b, t+1] @ W2 + b
    # Shifts via sublane rolls; rows that would leak across sequence / batch
    # boundaries are zeroed (matches PyTorch's zero padding at t=-1, t=L).
    pos = pos_ref[...]                                            # (BL, 1)
    x_prev = jnp.where(pos == 0, 0.0,
                       pltpu.roll(x, 1, axis=0))                  # x[t-1]
    x_next = jnp.where(pos == L - 1, 0.0,
                       pltpu.roll(x, BL - 1, axis=0))             # x[t+1]
    x3 = jnp.concatenate([x_prev, x, x_next], axis=1)             # (BL, 3E)
    conv = jnp.dot(x3, wtap_ref[...],
                   preferred_element_type=jnp.float32) + bconv_ref[...]  # (BL, H)

    # --- ReLU + masked_fill(-1e4) (dropout = identity at inference) ----------
    h = jnp.maximum(conv, 0.0)
    h = jnp.where(mask_ref[...] == 0.0, -10000.0, h)              # (BL, H)

    # --- max_pool1d over the full length, per batch item ----------------------
    pooled = jnp.concatenate(
        [jnp.max(h[i * L:(i + 1) * L, :], axis=0, keepdims=True)
         for i in range(Bblk)], axis=0)                           # (Bblk, H)

    # --- Output Linear, single lane-dense (Bblk, C) store ---------------------
    o_ref[...] = (jnp.dot(pooled, wout_ref[...],
                          preferred_element_type=jnp.float32)
                  + bout_ref[...])


def cnn_forward(src, mask, embed_w, conv_w, conv_b, out_w, out_b,
                *, batch_block=None):
    """Runs the fused CNNClassifier forward. src: (B, L) int32, mask: (B, L)."""
    B, L = src.shape
    V, E = embed_w.shape
    H = conv_w.shape[0]
    C = out_w.shape[0]
    if batch_block is None:
        batch_block = B           # whole batch in one grid step
        # (On v7x, set batch_block = B // 2 so both TensorCores get a
        #  "parallel" grid step each.)
    assert B % batch_block == 0
    BLb = batch_block * L

    # Parameter / input layout glue (tiny, done once in plain JAX).
    w_taps = jnp.concatenate([conv_w[:, :, k].T for k in range(3)],
                             axis=0).astype(jnp.float32)          # (3E, H)
    bconv = conv_b[None, :].astype(jnp.float32)                   # (1, H)
    wout = out_w.T.astype(jnp.float32)                            # (H, C)
    bout = out_b[None, :].astype(jnp.float32)                     # (1, C)

    src_flat = src.reshape(B * L, 1).astype(jnp.int32)            # (B*L, 1)
    pos = jnp.tile(jnp.arange(L, dtype=jnp.int32), B)[:, None]    # (B*L, 1)
    mask_flat = mask.reshape(B * L, 1).astype(jnp.float32)        # (B*L, 1)

    return pl.pallas_call(
        cnn_kernel,
        out_shape=jax.ShapeDtypeStruct((B, C), jnp.float32),
        grid_spec=pltpu.PrefetchScalarGridSpec(
            num_scalar_prefetch=0,
            grid=(B // batch_block,),
            in_specs=[
                pl.BlockSpec((BLb, 1), lambda b: (b, 0)),      # token ids
                pl.BlockSpec((BLb, 1), lambda b: (b, 0)),      # in-seq position
                pl.BlockSpec((BLb, 1), lambda b: (b, 0)),      # padding mask
                pl.BlockSpec((V, E), lambda b: (0, 0)),        # embedding table
                pl.BlockSpec((3 * E, H), lambda b: (0, 0)),    # stacked conv taps
                pl.BlockSpec((1, H), lambda b: (0, 0)),        # conv bias
                pl.BlockSpec((H, C), lambda b: (0, 0)),        # out weight
                pl.BlockSpec((1, C), lambda b: (0, 0)),        # out bias
            ],
            out_specs=pl.BlockSpec((batch_block, C), lambda b: (b, 0)),
        ),
        compiler_params=pltpu.CompilerParams(
            dimension_semantics=("parallel",)),
    )(src_flat, pos, mask_flat, embed_w.astype(jnp.float32),
      w_taps, bconv, wout, bout)


def reference(src, mask, embed_w, conv_w, conv_b, out_w, out_b):
    x = embed_w[src]                                   # (B, L, E)
    xt = jnp.transpose(x, (0, 2, 1))                   # (B, E, L)
    conv = jax.lax.conv_general_dilated(
        xt, conv_w, window_strides=(1,), padding=((1, 1),),
        dimension_numbers=("NCH", "OIH", "NCH"))
    conv = conv + conv_b[None, :, None]                # (B, H, L)
    h = jnp.maximum(conv, 0.0)
    h = jnp.where(mask[:, None, :] == 0, -10000.0, h)
    pooled = jnp.max(h, axis=-1)                       # (B, H)
    return pooled @ out_w.T + out_b


if __name__ == "__main__":
    # Small shapes consistent with the module.
    V, E, H, C = 50, 32, 32, 8     # vocab, embed, hidden, classes
    B, L = 2, 16                   # batch, sequence length

    key = jax.random.PRNGKey(0)
    k_emb, k_conv, k_out, k_src = jax.random.split(key, 4)

    # Deterministic parameter init mirroring the module's __init__.
    embed_w = 0.1 * jax.random.normal(k_emb, (V, E), dtype=jnp.float32)
    conv_w = jax.random.normal(k_conv, (H, E, 3), dtype=jnp.float32) * \
        math.sqrt(2.0 / (E * 3))                       # kaiming_normal
    conv_b = jnp.zeros((H,), dtype=jnp.float32)
    out_w = jax.random.normal(k_out, (C, H), dtype=jnp.float32) * \
        math.sqrt(2.0 / H)                             # kaiming_normal
    out_b = jnp.zeros((C,), dtype=jnp.float32)

    # Inputs: token ids + padding mask (lengths 16 and 10).
    src = jax.random.randint(k_src, (B, L), 0, V)
    lengths = jnp.array([16, 10], dtype=jnp.int32)
    mask = (jnp.arange(L)[None, :] < lengths[:, None]).astype(jnp.float32)

    # TODO(synk): Dropout is stochastic (training-only); implemented as
    # identity (inference semantics).
    out = cnn_forward(src, mask, embed_w, conv_w, conv_b, out_w, out_b)
    out = jax.block_until_ready(out)

    ref = jax.block_until_ready(
        reference(src, mask, embed_w, conv_w, conv_b, out_w, out_b))
    np.testing.assert_allclose(np.asarray(out), np.asarray(ref),
                               rtol=1e-3, atol=1e-3)

    print("KERNEL_OK")
</pallas_src>

<mosaic_0001>
module attributes {stable_mosaic.version = 11 : i64} {
  func.func @cnn_kernel(%arg0: i32, %arg1: memref<32x1xi32, #tpu.memory_space<vmem>>, %arg2: memref<32x1xi32, #tpu.memory_space<vmem>>, %arg3: memref<32x1xf32, #tpu.memory_space<vmem>>, %arg4: memref<50x32xf32, #tpu.memory_space<vmem>>, %arg5: memref<96x32xf32, #tpu.memory_space<vmem>>, %arg6: memref<1x32xf32, #tpu.memory_space<vmem>>, %arg7: memref<32x8xf32, #tpu.memory_space<vmem>>, %arg8: memref<1x8xf32, #tpu.memory_space<vmem>>, %arg9: memref<2x8xf32, #tpu.memory_space<vmem>>) attributes {dimension_semantics = [#tpu.dimension_semantics<parallel>], iteration_bounds = array<i64: 1>, scalar_prefetch = 0 : i64, scratch_operands = 0 : i64, tpu.core_type = #tpu.core_type<tc>, window_params = [{transform_indices = @transform_0, window_bounds = array<i64: 32, 1>}, {transform_indices = @transform_1, window_bounds = array<i64: 32, 1>}, {transform_indices = @transform_2, window_bounds = array<i64: 32, 1>}, {pipeline_mode = #tpu.pipeline_mode<synchronous>, transform_indices = @transform_3, window_bounds = array<i64: 50, 32>}, {pipeline_mode = #tpu.pipeline_mode<synchronous>, transform_indices = @transform_4, window_bounds = array<i64: 96, 32>}, {pipeline_mode = #tpu.pipeline_mode<synchronous>, transform_indices = @transform_5, window_bounds = array<i64: 1, 32>}, {pipeline_mode = #tpu.pipeline_mode<synchronous>, transform_indices = @transform_6, window_bounds = array<i64: 32, 8>}, {pipeline_mode = #tpu.pipeline_mode<synchronous>, transform_indices = @transform_7, window_bounds = array<i64: 1, 8>}, {transform_indices = @transform_8, window_bounds = array<i64: 2, 8>}]} {
    %c0 = arith.constant 0 : index
    %c0_0 = arith.constant 0 : index
    %0 = vector.load %arg1[%c0, %c0_0] : memref<32x1xi32, #tpu.memory_space<vmem>>, vector<32x1xi32>
    %1 = tpu.iota {dimensions = array<i32: 1>} : vector<32x50xi32>
    %2 = vector.broadcast %0 : vector<32x1xi32> to vector<32x50xi32>
    %3 = arith.cmpi eq, %1, %2 : vector<32x50xi32>
    %4 = arith.extui %3 : vector<32x50xi1> to vector<32x50xi32>
    %5 = arith.sitofp %4 : vector<32x50xi32> to vector<32x50xf32>
    %c0_1 = arith.constant 0 : index
    %c0_2 = arith.constant 0 : index
    %6 = vector.load %arg4[%c0_1, %c0_2] : memref<50x32xf32, #tpu.memory_space<vmem>>, vector<50x32xf32>
    %cst = arith.constant dense<0.000000e+00> : vector<32x32xf32>
    %7 = tpu.matmul %5, %6, %cst {dimension_numbers = #tpu.dot_dimension_numbers<[1], [0], [0], [1], [0, 0, 1, 1], [], []>} : vector<32x50xf32>, vector<50x32xf32>, vector<32x32xf32> -> vector<32x32xf32>
    %c0_3 = arith.constant 0 : index
    %c0_4 = arith.constant 0 : index
    %8 = vector.load %arg2[%c0_3, %c0_4] : memref<32x1xi32, #tpu.memory_space<vmem>>, vector<32x1xi32>
    %c0_i32 = arith.constant 0 : i32
    %9 = vector.broadcast %c0_i32 : i32 to vector<32x1xi32>
    %10 = arith.cmpi eq, %8, %9 : vector<32x1xi32>
    %c1_i32 = arith.constant 1 : i32
    %11 = tpu.dynamic_rotate %7 by %c1_i32 dim 0 : vector<32x32xf32>, i32 -> vector<32x32xf32>
    %cst_5 = arith.constant 0.000000e+00 : f32
    %12 = vector.shape_cast %10 : vector<32x1xi1> to vector<32x1xi1>
    %13 = vector.broadcast %12 : vector<32x1xi1> to vector<32x32xi1>
    %14 = vector.broadcast %cst_5 : f32 to vector<32x32xf32>
    %15 = arith.select %13, %14, %11 : vector<32x32xi1>, vector<32x32xf32>
    %c15_i32 = arith.constant 15 : i32
    %16 = vector.broadcast %c15_i32 : i32 to vector<32x1xi32>
    %17 = arith.cmpi eq, %8, %16 : vector<32x1xi32>
    %c31_i32 = arith.constant 31 : i32
    %18 = tpu.dynamic_rotate %7 by %c31_i32 dim 0 : vector<32x32xf32>, i32 -> vector<32x32xf32>
    %cst_6 = arith.constant 0.000000e+00 : f32
    %19 = vector.shape_cast %17 : vector<32x1xi1> to vector<32x1xi1>
    %20 = vector.broadcast %19 : vector<32x1xi1> to vector<32x32xi1>
    %21 = vector.broadcast %cst_6 : f32 to vector<32x32xf32>
    %22 = arith.select %20, %21, %18 : vector<32x32xi1>, vector<32x32xf32>
    %23 = tpu.concatenate %15, %7, %22 in 1 : vector<32x32xf32>, vector<32x32xf32>, vector<32x32xf32> -> vector<32x96xf32>
    %c0_7 = arith.constant 0 : index
    %c0_8 = arith.constant 0 : index
    %24 = vector.load %arg5[%c0_7, %c0_8] : memref<96x32xf32, #tpu.memory_space<vmem>>, vector<96x32xf32>
    %cst_9 = arith.constant dense<0.000000e+00> : vector<32x32xf32>
    %25 = tpu.matmul %23, %24, %cst_9 {dimension_numbers = #tpu.dot_dimension_numbers<[1], [0], [0], [1], [0, 0, 1, 1], [], []>} : vector<32x96xf32>, vector<96x32xf32>, vector<32x32xf32> -> vector<32x32xf32>
    %c0_10 = arith.constant 0 : index
    %c0_11 = arith.constant 0 : index
    %26 = vector.load %arg6[%c0_10, %c0_11] : memref<1x32xf32, #tpu.memory_space<vmem>>, vector<1x32xf32>
    %27 = vector.broadcast %26 : vector<1x32xf32> to vector<32x32xf32>
    %28 = arith.addf %25, %27 : vector<32x32xf32>
    %cst_12 = arith.constant 0.000000e+00 : f32
    %29 = vector.broadcast %cst_12 : f32 to vector<32x32xf32>
    %30 = arith.maximumf %28, %29 : vector<32x32xf32>
    %c0_13 = arith.constant 0 : index
    %c0_14 = arith.constant 0 : index
    %31 = vector.load %arg3[%c0_13, %c0_14] : memref<32x1xf32, #tpu.memory_space<vmem>>, vector<32x1xf32>
    %cst_15 = arith.constant 0.000000e+00 : f32
    %32 = vector.broadcast %cst_15 : f32 to vector<32x1xf32>
    %33 = arith.cmpf oeq, %31, %32 : vector<32x1xf32>
    %cst_16 = arith.constant -1.000000e+04 : f32
    %34 = vector.shape_cast %33 : vector<32x1xi1> to vector<32x1xi1>
    %35 = vector.broadcast %34 : vector<32x1xi1> to vector<32x32xi1>
    %36 = vector.broadcast %cst_16 : f32 to vector<32x32xf32>
    %37 = arith.select %35, %36, %30 : vector<32x32xi1>, vector<32x32xf32>
    %38 = vector.extract_strided_slice %37 {offsets = [0, 0], sizes = [16, 32], strides = [1, 1]} : vector<32x32xf32> to vector<16x32xf32>
    %cst_17 = arith.constant dense<0xFF800000> : vector<32xf32>
    %39 = vector.multi_reduction <maximumf>, %38, %cst_17 [0] : vector<16x32xf32> to vector<32xf32>
    %40 = vector.shape_cast %39 : vector<32xf32> to vector<1x32xf32>
    %41 = vector.extract_strided_slice %37 {offsets = [16, 0], sizes = [16, 32], strides = [1, 1]} : vector<32x32xf32> to vector<16x32xf32>
    %cst_18 = arith.constant dense<0xFF800000> : vector<32xf32>
    %42 = vector.multi_reduction <maximumf>, %41, %cst_18 [0] : vector<16x32xf32> to vector<32xf32>
    %43 = vector.shape_cast %42 : vector<32xf32> to vector<1x32xf32>
    %44 = tpu.concatenate %40, %43 in 0 : vector<1x32xf32>, vector<1x32xf32> -> vector<2x32xf32>
    %c0_19 = arith.constant 0 : index
    %c0_20 = arith.constant 0 : index
    %45 = vector.load %arg7[%c0_19, %c0_20] : memref<32x8xf32, #tpu.memory_space<vmem>>, vector<32x8xf32>
    %cst_21 = arith.constant dense<0.000000e+00> : vector<2x8xf32>
    %46 = tpu.matmul %44, %45, %cst_21 {dimension_numbers = #tpu.dot_dimension_numbers<[1], [0], [0], [1], [0, 0, 1, 1], [], []>} : vector<2x32xf32>, vector<32x8xf32>, vector<2x8xf32> -> vector<2x8xf32>
    %c0_22 = arith.constant 0 : index
    %c0_23 = arith.constant 0 : index
    %47 = vector.load %arg8[%c0_22, %c0_23] : memref<1x8xf32, #tpu.memory_space<vmem>>, vector<1x8xf32>
    %48 = vector.broadcast %47 : vector<1x8xf32> to vector<2x8xf32>
    %49 = arith.addf %46, %48 : vector<2x8xf32>
    %c0_24 = arith.constant 0 : index
    %c0_25 = arith.constant 0 : index
    %50 = vector.load %arg9[%c0_24, %c0_25] : memref<2x8xf32, #tpu.memory_space<vmem>>, vector<2x8xf32>
    tpu.vector_store %arg9[%c0_24, %c0_25], %49 {strides = array<i32>} : memref<2x8xf32, #tpu.memory_space<vmem>>, vector<2x8xf32>,
    return
  }
  func.func @transform_0(%arg0: i32) -> (i32, i32) {
    %c0_i32 = arith.constant 0 : i32
    %c0_i32_0 = arith.constant 0 : i32
    return %arg0, %c0_i32 : i32, i32
  }
  func.func @transform_1(%arg0: i32) -> (i32, i32) {
    %c0_i32 = arith.constant 0 : i32
    %c0_i32_0 = arith.constant 0 : i32
    return %arg0, %c0_i32 : i32, i32
  }
  func.func @transform_2(%arg0: i32) -> (i32, i32) {
    %c0_i32 = arith.constant 0 : i32
    %c0_i32_0 = arith.constant 0 : i32
    return %arg0, %c0_i32 : i32, i32
  }
  func.func @transform_3(%arg0: i32) -> (i32, i32) {
    %c0_i32 = arith.constant 0 : i32
    %c0_i32_0 = arith.constant 0 : i32
    %c0_i32_1 = arith.constant 0 : i32
    return %c0_i32, %c0_i32_0 : i32, i32
  }
  func.func @transform_4(%arg0: i32) -> (i32, i32) {
    %c0_i32 = arith.constant 0 : i32
    %c0_i32_0 = arith.constant 0 : i32
    %c0_i32_1 = arith.constant 0 : i32
    return %c0_i32, %c0_i32_0 : i32, i32
  }
  func.func @transform_5(%arg0: i32) -> (i32, i32) {
    %c0_i32 = arith.constant 0 : i32
    %c0_i32_0 = arith.constant 0 : i32
    %c0_i32_1 = arith.constant 0 : i32
    return %c0_i32, %c0_i32_0 : i32, i32
  }
  func.func @transform_6(%arg0: i32) -> (i32, i32) {
    %c0_i32 = arith.constant 0 : i32
    %c0_i32_0 = arith.constant 0 : i32
    %c0_i32_1 = arith.constant 0 : i32
    return %c0_i32, %c0_i32_0 : i32, i32
  }
  func.func @transform_7(%arg0: i32) -> (i32, i32) {
    %c0_i32 = arith.constant 0 : i32
    %c0_i32_0 = arith.constant 0 : i32
    %c0_i32_1 = arith.constant 0 : i32
    return %c0_i32, %c0_i32_0 : i32, i32
  }
  func.func @transform_8(%arg0: i32) -> (i32, i32) {
    %c0_i32 = arith.constant 0 : i32
    %c0_i32_0 = arith.constant 0 : i32
    return %arg0, %c0_i32 : i32, i32
  }
}

</mosaic_0001>

<bundles_post_ra>
// kernel: tpu_custom_call.1
= control target key start
LH: loop header
LB: loop body
LE: loop exit
PB: predicated region body
PF: predicated region fallthrough
CT: control target
= control target key end

     0   :  { %v748_v2 = vmov 0   ;;  %s971_s0 = inlined_call_operand.vmem [shape: s32[32,1], index: 0, kind: input, shape index: {}]   ;;  %s972_s1 = inlined_call_operand.vmem [shape: s32[32,1], index: 1, kind: input, shape index: {}]   ;;  %s973_s2 = inlined_call_operand.vmem [shape: f32[32,1], index: 2, kind: input, shape index: {}]   ;;  %s974_s3 = inlined_call_operand.vmem [shape: f32[50,32], index: 3, kind: input, shape index: {}]   ;;  %s975_s4 = inlined_call_operand.vmem [shape: f32[96,32], index: 4, kind: input, shape index: {}]   ;;  %s976_s5 = inlined_call_operand.vmem [shape: f32[1,32], index: 5, kind: input, shape index: {}]   ;;  %s977_s6 = inlined_call_operand.vmem [shape: f32[32,8], index: 6, kind: input, shape index: {}]   ;;  %s978_s7 = inlined_call_operand.vmem [shape: f32[1,8], index: 7, kind: input, shape index: {}]   ;;  %s979_s8 = inlined_call_operand.hbm [shape: f32[2,8], index: 8, kind: output, shape index: {}]  }
   0x1   :  { %v32_v0 = vld [vmem:[%s971_s0 + $0x10] sm:$0xff]  ;;  %v30_v1 = vld [vmem:[%s971_s0] sm:$0xff]  ;;  %723 = vset.pattern.permute.xlu1 %v748_v2  ;;  %722 = vset.pattern.permute.xlu0 %v748_v2  ;;  %v170_v3 = vld [vmem:[%s972_s1 + $0x8] sm:$0xff] }
   0x2   :  { %v169_v4 = vld [vmem:[%s972_s1] sm:$0xff]  ;;  %43 = vperm.xlu1 %723, %v32_v0   ;;  %37 = vperm.xlu0 %722, %v30_v1   ;;  %v33_v5 = vld [vmem:[%s971_s0 + $0x18] sm:$0xff]  ;;  %v31_v6 = vld [vmem:[%s971_s0 + $0x8] sm:$0xff]  ;;  %vm213_vm0 = vcmp.eq.s32.totalorder %v170_v3, 15 }
   0x3   :  { %v60_v7 = vld [vmem:[%s974_s3] sm:$0xff]  ;;  %v61_v8 = vld [vmem:[%s974_s3 + $0x8] sm:$0xff]  ;;  %vm212_vm1 = vcmp.eq.s32.totalorder %v169_v4, 15  ;;  %v62_v9 = vld [vmem:[%s974_s3 + $0x10] sm:$0xff] }
   0x4   :  { %v63_v10 = vld [vmem:[%s974_s3 + $0x18] sm:$0xff]  ;;  %v171_v12 = vld [vmem:[%s972_s1 + $0x10] sm:$0xff]  ;;  %v673_v13 = vpack.c.bf16 %v61_v8, %v60_v7  ;;  %v64_v15 = vld [vmem:[%s974_s3 + $0x20] sm:$0xff] }
   0x5   :  { %v172_v11 = vld [vmem:[%s972_s1 + $0x18] sm:$0xff]  ;;  %v677_v14 = vpack.c.bf16 %v63_v10, %v62_v9  ;;  %v65_v16 = vld [vmem:[%s974_s3 + $0x28] sm:$0xff] }
   0x6   :  { %46 = vperm.xlu1 %723, %v33_v5   ;;  %40 = vperm.xlu0 %722, %v31_v6  }
   0x7   :  { %13 = vsyncpa [#allocation3], 0  ;;  %v226_v17 = vsel %vm213_vm0, 1, %v748_v2  ;;  %v225_v18 = vsel %vm212_vm1, 1, %v748_v2  ;;  %674 = vmatprep.subr.bf16.mxu0 %v673_v13  ;;  %vm215_vm2 = vcmp.eq.s32.totalorder %v172_v11, 15  ;;  %vm214_vm3 = vcmp.eq.s32.totalorder %v171_v12, 15 }
   0x8   :  { %676 = vmatpush3.bf16.msra.mxu0 %v673_v13  ;;  %v681_v19 = vpack.c.bf16 %v65_v16, %v64_v15  ;;  %v228_v20 = vsel %vm215_vm2, 1, %v748_v2  ;;  %v227_v21 = vsel %vm214_vm3, 1, %v748_v2  ;;  %vm174_vm4 = vcmp.eq.s32.totalorder %v170_v3, 0  ;;  %v66_v22 = vld [vmem:[%s974_s3 + $0x30] sm:$0x3]  ;;  %v291_v38 = vld [vmem:[%s975_s4] sm:$0xff] }
   0x9   :  { %678 = vmatprep.subr.bf16.mxu0 %v677_v14  ;;  %vm173_vm5 = vcmp.eq.s32.totalorder %v169_v4, 0  ;;  %vm80_vm6 = vcmask 1041408   ;;  %v189_v23 = vsel %vm174_vm4, 1, %v748_v2  ;;  %vm176_vm7 = vcmp.eq.s32.totalorder %v172_v11, 0  ;;  %v292_v39 = vld [vmem:[%s975_s4 + $0x8] sm:$0xff]  ;;  %v293_v40 = vld [vmem:[%s975_s4 + $0x10] sm:$0xff] }
   0xa   :  { %233 = vperm.xlu1 %723, %v226_v17   ;;  %230 = vperm.xlu0 %722, %v225_v18   ;;  %v188_v24 = vsel %vm173_vm5, 1, %v748_v2  ;;  %vm175_vm8 = vcmp.eq.s32.totalorder %v171_v12, 0  ;;  %v191_v25 = vsel %vm176_vm7, 1, %v748_v2  ;;  %v34_v27 = vlaneseq  ;;  %v294_v42 = vld [vmem:[%s975_s4 + $0x18] sm:$0xff]  ;;  %v295_v44 = vld [vmem:[%s975_s4 + $0x20] sm:$0xff]  ;;  %v296_v45 = vld [vmem:[%s975_s4 + $0x28] sm:$0xff] }
   0xb   :  { %v190_v26 = vsel %vm175_vm8, 1, %v748_v2  ;;  %vm67_vm9 = vcmask 408576   ;;  %v749_v31 = vmov 0.0   ;;  %v685_v41 = vpack.c.bf16 %v292_v39, %v291_v38  ;;  %v297_v47 = vld [vmem:[%s975_s4 + $0x30] sm:$0xff]  ;;  %v298_v48 = vld [vmem:[%s975_s4 + $0x38] sm:$0xff]  ;;  %v299_v50 = vld [vmem:[%s975_s4 + $0x40] sm:$0xff] }
   0xc   :  { %680 = vmatpush3.bf16.msra.mxu0 %v677_v14  ;;  %v35_v28 = vand.u32 127, %v34_v27  ;;  %v689_v43 = vpack.c.bf16 %v294_v42, %v293_v40  ;;  %v693_v46 = vpack.c.bf16 %v296_v45, %v295_v44  ;;  %v697_v49 = vpack.c.bf16 %v298_v48, %v297_v47  ;;  %v300_v51 = vld [vmem:[%s975_s4 + $0x48] sm:$0xff]  ;;  %v301_v53 = vld [vmem:[%s975_s4 + $0x50] sm:$0xff]  ;;  %v302_v54 = vld [vmem:[%s975_s4 + $0x58] sm:$0xff]  ;;  %s750_s10 = smov 32   ;;  %s751_s4 = smov 64  }
   0xd   :  { %682 = vmatprep.subr.bf16.mxu0 %v681_v19  ;;  %686 = vmatprep.subr.bf16.mxu1 %v685_v41  ;;  %v701_v52 = vpack.c.bf16 %v300_v51, %v299_v50  ;;  %v705_v55 = vpack.c.bf16 %v302_v54, %v301_v53  ;;  %v182_v56 = vshrl.u32 %v34_v27, 7  ;;  %v413_v18 = vld [vmem:[%s973_s2 + $0x8] sm:$0xff]  ;;  %vm281_vm8 = vcmask 261120   ;;  %v464_v54 = vld [vmem:[%s977_s6] sm:$0xff]  ;;  %s754_s26 = smov [#allocation2]  }
   0xe   :  { %239 = vperm.xlu1 %723, %v228_v20   ;;  %236 = vperm.xlu0 %722, %v227_v21   ;;  %vm417_vm4 = vcmp.eq.f32.partialorder %v413_v18, 0.0  ;;  %s556_s27 = sshll.u32 %s754_s26, 4  ;;  %s557_s27 = int_to_ptr.vmem [resolvable:$true] %s556_s27 }
   0xf   :  { %688 = vmatpush3.bf16.msra.mxu1 %v685_v41  ;;  %vm220_vm14 = vcmp.lt.s32.totalorder %v182_v56, 7  ;;  %vm183_vm15 = vcmp.lt.s32.totalorder %v182_v56, 1  ;;  %s724_s28 = scalar_lea.vmem %s557_s27, 32  ;;  %p729_p1 = scmp.lt.s32.totalorder %s557_s27, %s557_s27 }
  0x10   :  { %684 = vmatpush3.bf16.msra.mxu0 %v681_v19  ;;  %690 = vmatprep.subr.bf16.mxu1 %v689_v43  ;;  %v412_v19 = vld [vmem:[%s973_s2] sm:$0xff]  ;;  %p725_p0 = scmp.ne.s32.totalorder %s557_s27, %s724_s28  ;;  %p730_p2 = scmp.lt.s32.totalorder %s724_s28, %s724_s28 }
  0x11   :  { %624 = vmatprep.subr.msk.mxu0 %vm80_vm6, %v66_v22  ;;  %vm416_vm5 = vcmp.eq.f32.partialorder %v412_v19, 0.0 }
  0x12   :  { %196 = vperm.xlu1 %723, %v189_v23   ;;  %193 = vperm.xlu0 %722, %v188_v24   ;;  %v415_v24 = vld [vmem:[%s973_s2 + $0x18] sm:$0xff]  ;;  %v420_v27 = vsel %vm416_vm5, 1, %v748_v2  ;;  %vm548_vm5 = vcmask 58368   ;;  %p731_p3 = por %p730_p2, %p729_p1 }
  0x13   :  { %692 = vmatpush3.bf16.msra.mxu1 %v689_v43 }
  0x14   :  { %625 = vmatpush3.msk.msra.mxu0 %vm80_vm6, %v66_v22  ;;  %694 = vmatprep.subr.bf16.mxu1 %v693_v46  ;;  %vm419_vm6 = vcmp.eq.f32.partialorder %v415_v24, 0.0  ;;  %p732_p4 = pnand %p731_p3, %p725_p0 }
  0x16   :  { %202 = vperm.xlu1 %723, %v191_v25   ;;  %199 = vperm.xlu0 %722, %v190_v26   ;;  %v414_v25 = vld [vmem:[%s973_s2 + $0x10] sm:$0xff]  ;;  %v421_v26 = vsel %vm417_vm4, 1, %v748_v2  ;;  %vm462_vm4 = vcmask 1040384  }
  0x17   :  { %696 = vmatpush3.bf16.msra.mxu1 %v693_v46  ;;  %vm418_vm7 = vcmp.eq.f32.partialorder %v414_v25, 0.0 }
  0x18   :  { %698 = vmatprep.subr.bf16.mxu1 %v697_v49 }
  0x1b   :  { %700 = vmatpush3.bf16.msra.mxu1 %v697_v49 }
  0x1c   :  { %702 = vmatprep.subr.bf16.mxu1 %v701_v52 }
  0x1f   :  { %704 = vmatpush3.bf16.msra.mxu1 %v701_v52 }
  0x20   :  { %706 = vmatprep.subr.bf16.mxu1 %v705_v55 }
  0x23   :  { %708 = vmatpush3.bf16.msra.mxu1 %v705_v55  ;;  %v465_v55 = vld [vmem:[%s977_s6 + $0x8] sm:$0xff] }
  0x24   :  { %v710_v56 = vpack.c.bf16 %v465_v55, %v464_v54 }
  0x81   :  { %v44_v29 = vpop.permute.xlu1 %43  ;;  %v38_v30 = vpop.permute.xlu0 %37 }
  0x82   :  { %vm48_vm10 = vcmp.eq.s32.totalorder %v35_v28, %v38_v30  ;;  %vm50_vm11 = vcmp.eq.s32.totalorder %v35_v28, %v44_v29  ;;  %v422_v29 = vsel %vm418_vm7, 1, %v748_v2 }
  0x83   :  { %v564_v32 = vsel %vm48_vm10, 1.0, %v749_v31  ;;  %v566_v35 = vsel %vm50_vm11, 1.0, %v749_v31  ;;  %vm286_vm10 = vcmask 523264   ;;  %vm310_vm11 = vcmask 785408  }
  0x84   :  { %626 = vmatprep.mubr.msk.f32.mxu0 %vm67_vm9, %v564_v32 }
  0x85   :  { %v47_v33 = vpop.permute.xlu1 %46  ;;  %v41_v34 = vpop.permute.xlu0 %40 }
  0x86   :  { %vm49_vm12 = vcmp.eq.s32.totalorder %v35_v28, %v41_v34  ;;  %vm51_vm13 = vcmp.eq.s32.totalorder %v35_v28, %v47_v33  ;;  %v423_v28 = vsel %vm419_vm6, 1, %v748_v2 }
  0x87   :  { %v565_v36 = vsel %vm49_vm12, 1.0, %v749_v31  ;;  %v567_v37 = vsel %vm51_vm13, 1.0, %v749_v31 }
  0x88   :  { %627 = vmatmul.mubr.msk.f32.vlgmr.msra.gmra.mrb[0].mxu0 %vm67_vm9, %v565_v36 }
  0x89   :  { %629 = vmatprep.mubr.msk.f32.mxu0 %vm67_vm9, %v566_v35  ;;  %v231_v58 = vpop.permute.xlu0 %230  ;;  %v234_v0 = vpop.permute.xlu1 %233 }
  0x8a   :  { %vm241_vm0 = vcmp.eq.s32.totalorder %v231_v58, 1  ;;  %vm242_vm1 = vcmp.eq.s32.totalorder %v234_v0, 1  ;;  %v466_v58 = vld [vmem:[%s977_s6 + $0x10] sm:$0xff] }
  0x8c   :  { %630 = vmatmul.mubr.msk.f32.gmra.mrb[2].mxu0 %vm67_vm9, %v567_v37 }
  0x8d   :  { %v240_v15 = vpop.permute.xlu1 %239  ;;  %v237_v16 = vpop.permute.xlu0 %236 }
  0x8e   :  { %vm244_vm2 = vcmp.eq.s32.totalorder %v240_v15, 1  ;;  %vm243_vm3 = vcmp.eq.s32.totalorder %v237_v16, 1 }
  0x91   :  { %v197_v30 = vpop.permute.xlu1 %196  ;;  %v194_v32 = vpop.permute.xlu0 %193 }
  0x92   :  { %vm204_vm9 = vcmp.eq.s32.totalorder %v194_v32, 1  ;;  %vm205_vm12 = vcmp.eq.s32.totalorder %v197_v30, 1 }
  0x95   :  { %v203_v33 = vpop.permute.xlu1 %202  ;;  %v200_v34 = vpop.permute.xlu0 %199 }
  0x96   :  { %vm207_vm13 = vcmp.eq.s32.totalorder %v203_v33, 1 }
 0x15b   :  { %v628_v57 = vpop.f32.mrb[0].mxu0 }
 0x15c   :  { %v178_v59 = vrot.slane %v628_v57, 7  ;;  %v217_v60 = vrot.slane %v628_v57, 1  ;;  %255 = vrot.lane.b32.xlu1 %v628_v57, %s750_s10  ;;  %v150_v61 = vpop.f32.mrb[1].mxu0  ;;  %v752_v57 = vmov 0.0|0.0  }
 0x15d   :  { %v177_v62 = vrot.slane %v150_v61, 7  ;;  %v216_v63 = vrot.slane %v150_v61, 1  ;;  %253 = vrot.lane.b32.xlu0 %v150_v61, %s750_s10  ;;  %709 = vmatprep.subr.bf16.mxu0 %v752_v57  ;;  %v573_v61 = vld [vmem:[%s976_s5] ss:$0 sm:$0xff] }
 0x15e   :  { %711 = vmatpush3.bf16.msra.mxu0 %v710_v56 }
 0x15f   :  { %v631_v1 = vpop.f32.mrb[2].mxu0  ;;  %v223_v3 = vsel %vm220_vm14, %v216_v63, %v217_v60  ;;  %v186_v4 = vsel %vm183_vm15, %v177_v62, %v178_v59  ;;  %712 = vmatprep.subr.bf16.mxu0 %v752_v57 }
 0x160   :  { %v180_v5 = vrot.slane %v631_v1, 7  ;;  %v219_v6 = vrot.slane %v631_v1, 1  ;;  %259 = vrot.lane.b32.xlu1 %v631_v1, %s750_s10  ;;  %v160_v7 = vpop.f32.mrb[3].mxu0  ;;  %v245_v8 = vsel %vm241_vm0, 0.0, %v223_v3  ;;  %v209_v2 = vsel %vm205_vm12, 0.0, %v186_v4 }
 0x161   :  { %v179_v9 = vrot.slane %v160_v7, 7  ;;  %v218_v10 = vrot.slane %v160_v7, 1  ;;  %269 = vrot.lane.b32.xlu0 %v245_v8, %s751_s4 }
 0x162   :  { %v224_v11 = vsel %vm220_vm14, %v219_v6, %v216_v63  ;;  %v187_v12 = vsel %vm183_vm15, %v180_v5, %v177_v62 }
 0x163   :  { %v222_v13 = vsel %vm220_vm14, %v217_v60, %v218_v10  ;;  %v221_v14 = vsel %vm220_vm14, %v218_v10, %v219_v6  ;;  %v184_v20 = vsel %vm183_vm15, %v179_v9, %v180_v5  ;;  %v185_v21 = vsel %vm183_vm15, %v178_v59, %v179_v9  ;;  %v467_v59 = vld [vmem:[%s977_s6 + $0x18] sm:$0xff] }
 0x164   :  { %v246_v17 = vsel %vm242_vm1, 0.0, %v222_v13  ;;  %v248_v22 = vsel %vm244_vm2, 0.0, %v224_v11  ;;  %v247_v23 = vsel %vm243_vm3, 0.0, %v221_v14  ;;  %v208_v37 = vsel %vm204_vm9, 0.0, %v187_v12 }
 0x165   :  { %271 = vrot.lane.b32.xlu1 %v246_v17, %s751_s4  ;;  %257 = vrot.lane.b32.xlu0 %v160_v7, %s750_s10  ;;  %vm206_vm14 = vcmp.eq.s32.totalorder %v200_v34, 1  ;;  %v211_v46 = vsel %vm207_vm13, 0.0, %v184_v20  ;;  %v713_v60 = vpack.c.bf16 %v467_v59, %v466_v58  ;;  %vm753_vm15 = vmmov 0  }
 0x166   :  { %v210_v47 = vsel %vm206_vm14, 0.0, %v185_v21  ;;  %670 = vmatprep.mubr.msk.f32.mxu0 %vm753_vm15, %v749_v31 }
 0x167   :  { %714 = vmatpush3.bf16.msra.mxu0 %v713_v60 }
 0x169   :  { %275 = vrot.lane.b32.xlu1 %v248_v22, %s751_s4  ;;  %273 = vrot.lane.b32.xlu0 %v247_v23, %s751_s4 }
 0x16d   :  { %428 = vperm.xlu1 %723, %v421_v26   ;;  %425 = vperm.xlu0 %722, %v420_v27  }
 0x171   :  { %434 = vperm.xlu1 %723, %v423_v28   ;;  %431 = vperm.xlu0 %722, %v422_v29  }
 0x1ce   :  { %v256_v35 = vpop.permute.xlu1 %255 }
 0x1cf   :  { %v254_v36 = vpop.permute.xlu0 %253  ;;  %v283_v42 = vsel %vm281_vm8, %v209_v2, %v256_v35 }
 0x1d0   :  { %v282_v39 = vsel %vm281_vm8, %v208_v37, %v254_v36 }
 0x1d2   :  { %v260_v38 = vpop.permute.xlu1 %259 }
 0x1d3   :  { %v270_v40 = vpop.permute.xlu0 %269  ;;  %v285_v48 = vsel %vm281_vm8, %v211_v46, %v260_v38  ;;  %v578_v38 = vld [vmem:[%s978_s7] ss:$0 sm:$0xff] }
 0x1d4   :  { %v287_v41 = vsel %vm286_vm10, %v282_v39, %v270_v40 }
 0x1d5   :  { %656 = vmatprep.mubr.msk.f32.mxu1 %vm310_vm11, %v287_v41 }
 0x1d7   :  { %v272_v43 = vpop.permute.xlu1 %271  ;;  %v258_v44 = vpop.permute.xlu0 %257 }
 0x1d8   :  { %v288_v45 = vsel %vm286_vm10, %v283_v42, %v272_v43  ;;  %v284_v49 = vsel %vm281_vm8, %v210_v47, %v258_v44 }
 0x1d9   :  { %657 = vmatmul.mubr.msk.f32.vlgmr.msra.gmra.mrb[0].mxu1 %vm310_vm11, %v288_v45 }
 0x1db   :  { %v276_v50 = vpop.permute.xlu1 %275  ;;  %v274_v51 = vpop.permute.xlu0 %273 }
 0x1dc   :  { %v290_v52 = vsel %vm286_vm10, %v285_v48, %v276_v50  ;;  %v289_v53 = vsel %vm286_vm10, %v284_v49, %v274_v51 }
 0x1dd   :  { %659 = vmatprep.mubr.msk.f32.mxu1 %vm310_vm11, %v289_v53 }
 0x1de   :  { %660 = vmatmul.mubr.msk.f32.gmra.mrb[2].mxu1 %vm310_vm11, %v290_v52 }
 0x1ec   :  { %v429_v62 = vpop.permute.xlu1 %428  ;;  %v426_v0 = vpop.permute.xlu0 %425 }
 0x1ed   :  { %vm437_vm0 = vcmp.eq.s32.totalorder %v429_v62, 1  ;;  %vm436_vm1 = vcmp.eq.s32.totalorder %v426_v0, 1 }
 0x1f0   :  { %v435_v9 = vpop.permute.xlu1 %434  ;;  %v432_v13 = vpop.permute.xlu0 %431 }
 0x1f1   :  { %vm439_vm2 = vcmp.eq.s32.totalorder %v435_v9, 1  ;;  %vm438_vm3 = vcmp.eq.s32.totalorder %v432_v13, 1 }
 0x2ac   :  { %v658_v63 = vpop.f32.mrb[0].mxu1 }
 0x2ad   :  { %v395_v1 = vadd.f32 %v658_v63, %v573_v61  ;;  %v389_v3 = vpop.f32.mrb[1].mxu1 }
 0x2ae   :  { %v390_v4 = vadd.f32 %v573_v61, %v389_v3 }
 0x2af   :  { %v409_v5 = vmax.f32 %v395_v1, 0.0 }
 0x2b0   :  { %v408_v6 = vmax.f32 %v390_v4, 0.0 }
 0x2b1   :  { %v441_v7 = vsel %vm437_vm0, -10000.0, %v409_v5  ;;  %v661_v8 = vpop.f32.mrb[2].mxu1 }
 0x2b2   :  { %v445_v10 = vsel %vm281_vm8, %v441_v7, -inf  ;;  %v440_v31 = vsel %vm436_vm1, -10000.0, %v408_v6  ;;  %v405_v11 = vadd.f32 %v661_v8, %v573_v61  ;;  %v399_v12 = vpop.f32.mrb[3].mxu1 }
 0x2b3   :  { %v444_v14 = vsel %vm281_vm8, %v440_v31, -inf  ;;  %v400_v15 = vadd.f32 %v573_v61, %v399_v12 }
 0x2b4   :  { %v446_v16 = vmax.f32 %v444_v14, %v445_v10  ;;  %v411_v17 = vmax.f32 %v405_v11, 0.0 }
 0x2b5   :  { %v410_v18 = vmax.f32 %v400_v15, 0.0 }
 0x2b6   :  { %v447_v19 = vrot.slane %v446_v16, 4  ;;  %v443_v20 = vsel %vm439_vm2, -10000.0, %v411_v17 }
 0x2b7   :  { %v454_v21 = vsel %vm281_vm8, %v443_v20, -inf  ;;  %v442_v22 = vsel %vm438_vm3, -10000.0, %v410_v18 }
 0x2b8   :  { %v448_v23 = vmax.f32 %v446_v16, %v447_v19  ;;  %v453_v24 = vsel %vm281_vm8, %v442_v22, -inf }
 0x2b9   :  { %v455_v25 = vmax.f32 %v453_v24, %v454_v21 }
 0x2ba   :  { %v449_v26 = vrot.slane %v448_v23, 2 }
 0x2bb   :  { %v456_v27 = vrot.slane %v455_v25, 4 }
 0x2bc   :  { %v450_v28 = vmax.f32 %v448_v23, %v449_v26 }
 0x2bd   :  { %v457_v29 = vmax.f32 %v455_v25, %v456_v27 }
 0x2be   :  { %v451_v32 = vrot.slane %v450_v28, 1 }
 0x2bf   :  { %v458_v30 = vrot.slane %v457_v29, 2 }
 0x2c0   :  { %v452_v35 = vmax.f32 %v450_v28, %v451_v32 }
 0x2c1   :  { %v459_v33 = vmax.f32 %v457_v29, %v458_v30 }
 0x2c3   :  { %v460_v34 = vrot.slane %v459_v33, 1 }
 0x2c5   :  { %v461_v36 = vmax.f32 %v459_v33, %v460_v34 }
 0x2c7   :  { %v463_v37 = vsel %vm462_vm4, %v452_v35, %v461_v36 }
 0x2c8   :  { %671 = vmatmul.mubr.msk.f32.vlgmr.msra.gmra.mrb[4].mxu0 %vm281_vm8, %v463_v37 }
 0x39b   :  { %v544_v39 = vpop.f32.mrb[4].mxu0 }
 0x39c   :  { %v545_v40 = vadd.f32 %v578_v38, %v544_v39  ;;  %v672_v41 = vpop.f32.mrb[5].mxu0 }
 0x39e   :  { %549 = vst.msk [vmem:[#allocation2] sm:$0x3] %vm548_vm5, %v545_v40 }
 0x39f   :  { %735 = shalt.err (!%p732_p4)
}
 0x3a0   :  { %s736_s9 = scalar_lea.hbm %s979_s8, 32 }
 0x3a1   :  { %p737_p5 = scmp.ne.s32.totalorder %s979_s8, %s736_s9  ;;  %p740_p6 = scmp.lt.u32.totalorder %s736_s9, %s979_s8 }
 0x3a3   :  { %p742_p7 = pnand %p740_p6, %p737_p5 }
 0x3a5   :  { %745 = shalt.err (!%p742_p7)
}
 0x3a6   :  { %559 = dma.vmem_to_hbm [thread:$0]  %s557_s27, 32, %s979_s8, [#allocation3]  }
 0x3a7   :  { %746 = dma.done.wait [#allocation3], 32  }
 0x3a8   :  { %747 = vsyncadd [#allocation3], 4294967264 }
 0x3a9   :  { %563 = vsyncpa [#allocation3], 1 }

</bundles_post_ra>
